<compile_context>
chip_gen: v7x
topology: tpu7x:2x2x1
jax: 0.10.0
libtpu: 0.0.40
codegen_flags: <defaults>
</compile_context>

<pallas_src>
import functools

import jax
import jax.numpy as jnp
from jax.experimental import pallas as pl
from jax.experimental.pallas import tpu as pltpu

LANE = 128
MAX_CHUNK_ROWS = 512   # 512*128 f32 = 256 KiB per input tile; x2 inputs x2 buffers ~ 1 MiB VMEM


def _ncc_kernel(a_ref, b_ref, out_ref,
                sa_ref, sb_ref, saa_ref, sbb_ref, sab_ref,
                *, inv_n, eps):
    # a_ref / b_ref: (1, TR, 128) f32 tiles of the flattened inputs
    # out_ref: (1, 1, 128) per-batch output (value broadcast into the lanes)
    # s*_ref:  (1, 128) f32 running-moment accumulators (persist across chunks)
    n_idx = pl.program_id(1)

    @pl.when(n_idx == 0)
    def _init():
        sa_ref[...] = jnp.zeros_like(sa_ref)
        sb_ref[...] = jnp.zeros_like(sb_ref)
        saa_ref[...] = jnp.zeros_like(saa_ref)
        sbb_ref[...] = jnp.zeros_like(sbb_ref)
        sab_ref[...] = jnp.zeros_like(sab_ref)

    a = a_ref[0]            # (TR, 128)
    b = b_ref[0]            # (TR, 128)

    # Sublane (XLU) reductions to lane vectors; keeps VALU work minimal.
    sa_ref[...] += jnp.sum(a, axis=0, keepdims=True)
    sb_ref[...] += jnp.sum(b, axis=0, keepdims=True)
    saa_ref[...] += jnp.sum(a * a, axis=0, keepdims=True)
    sbb_ref[...] += jnp.sum(b * b, axis=0, keepdims=True)
    sab_ref[...] += jnp.sum(a * b, axis=0, keepdims=True)

    @pl.when(n_idx == pl.num_programs(1) - 1)
    def _finalize():
        s_a = jnp.sum(sa_ref[...])
        s_b = jnp.sum(sb_ref[...])
        s_aa = jnp.sum(saa_ref[...])
        s_bb = jnp.sum(sbb_ref[...])
        s_ab = jnp.sum(sab_ref[...])

        # Centered statistics from raw moments (N = true, un-padded count).
        dev_ab_sum = s_ab - s_a * s_b * inv_n
        dev_aa_sum = jnp.maximum(s_aa - s_a * s_a * inv_n, 0.0)
        dev_bb_sum = jnp.maximum(s_bb - s_b * s_b * inv_n, 0.0)

        # sum_n [(A_c*B_c + eps/N) / (sqrt(SS_A*SS_B) + eps)]
        #   == (dev_ab_sum + eps) / (sqrt(dev_aa_sum*dev_bb_sum) + eps)
        ncc_val = (dev_ab_sum + eps) / (jnp.sqrt(dev_aa_sum * dev_bb_sum) + eps)
        out_ref[...] = jnp.full(out_ref.shape, ncc_val, dtype=out_ref.dtype)


def ncc(A, B, eps=1e-08, reduction='mean'):
    """Equivalent of NCC(eps, reduction).forward(A, B)."""
    A = jnp.asarray(A, dtype=jnp.float32)
    B = jnp.asarray(B, dtype=jnp.float32)
    assert A.shape == B.shape
    bsz = A.shape[0]
    n_true = 1
    for d in A.shape[1:]:
        n_true *= int(d)

    a = A.reshape(bsz, n_true)
    b = B.reshape(bsz, n_true)

    # Lane-align and chunk the reduction axis.
    rows = -(-n_true // LANE)                      # ceil(N / 128)
    tr = min(rows, MAX_CHUNK_ROWS)
    tr = -(-tr // 8) * 8                           # multiple of 8 sublanes
    num_chunks = -(-rows // tr)
    rows_pad = num_chunks * tr
    n_pad = rows_pad * LANE
    if n_pad != n_true:
        a = jnp.pad(a, ((0, 0), (0, n_pad - n_true)))
        b = jnp.pad(b, ((0, 0), (0, n_pad - n_true)))
    a3 = a.reshape(bsz, rows_pad, LANE)
    b3 = b.reshape(bsz, rows_pad, LANE)

    kernel = functools.partial(_ncc_kernel, inv_n=1.0 / float(n_true),
                               eps=float(eps))

    out = pl.pallas_call(
        kernel,
        out_shape=jax.ShapeDtypeStruct((bsz, 1, LANE), jnp.float32),
        grid_spec=pltpu.PrefetchScalarGridSpec(
            num_scalar_prefetch=0,
            grid=(bsz, num_chunks),
            in_specs=[
                pl.BlockSpec((1, tr, LANE), lambda bi, ni: (bi, ni, 0)),
                pl.BlockSpec((1, tr, LANE), lambda bi, ni: (bi, ni, 0)),
            ],
            out_specs=pl.BlockSpec((1, 1, LANE), lambda bi, ni: (bi, 0, 0)),
            scratch_shapes=[pltpu.VMEM((1, LANE), jnp.float32)] * 5,
        ),
        compiler_params=pltpu.CompilerParams(
            dimension_semantics=("parallel", "arbitrary")),
        cost_estimate=pl.CostEstimate(
            flops=8 * bsz * n_pad,
            transcendentals=0,
            bytes_accessed=2 * bsz * n_pad * 4 + bsz * LANE * 4),
    )(a3, b3)

    per_batch = out[:, 0, 0]                       # (B,) : per-batch sum over dim 1
    if reduction == 'mean':
        return jnp.mean(per_batch)
    elif reduction == 'sum':
        return jnp.sum(per_batch)
    else:
        raise KeyError('unsupported reduction type: %s' % reduction)


def _ncc_reference(A, B, eps=1e-08, reduction='mean'):
    """Pure-JAX mirror of the PyTorch NCC.forward (two-pass, for verification)."""
    bsz = A.shape[0]
    a = A.reshape(bsz, -1).astype(jnp.float32)
    b = B.reshape(bsz, -1).astype(jnp.float32)
    a = a - jnp.mean(a, axis=1, keepdims=True)
    b = b - jnp.mean(b, axis=1, keepdims=True)
    dev_ab = a * b
    dev_aa_sum = jnp.sum(a * a, axis=1, keepdims=True)
    dev_bb_sum = jnp.sum(b * b, axis=1, keepdims=True)
    ncc_el = (dev_ab + eps / dev_ab.shape[1]) / (
        jnp.sqrt(dev_aa_sum * dev_bb_sum) + eps)
    if reduction == 'mean':
        return jnp.mean(jnp.sum(ncc_el, axis=1))
    return jnp.sum(ncc_el)


if __name__ == "__main__":
    key = jax.random.PRNGKey(0)
    k1, k2 = jax.random.split(key)
    # small NCHW image-like inputs: batch=2, channels=4, 16x16
    A = jax.random.uniform(k1, (2, 4, 16, 16), dtype=jnp.float32)
    noise = jax.random.uniform(k2, (2, 4, 16, 16), dtype=jnp.float32)
    Bx = 0.7 * A + 0.3 * noise          # correlated pair -> non-trivial NCC

    out = ncc(A, Bx)
    jax.block_until_ready(out)

    ref = _ncc_reference(A, Bx)
    assert jnp.isfinite(out), "NCC is not finite"
    assert jnp.allclose(out, ref, rtol=1e-3, atol=1e-5), (out, ref)

    # independent inputs (NCC near zero) as a second check
    out2 = ncc(A, noise)
    ref2 = _ncc_reference(A, noise)
    assert jnp.allclose(out2, ref2, rtol=1e-3, atol=1e-4), (out2, ref2)

    print("KERNEL_OK")
</pallas_src>

<mosaic_0001>
module attributes {stable_mosaic.version = 11 : i64} {
  func.func @_ncc_kernel(%arg0: i32, %arg1: i32, %arg2: memref<1x8x128xf32, #tpu.memory_space<vmem>>, %arg3: memref<1x8x128xf32, #tpu.memory_space<vmem>>, %arg4: memref<1x1x128xf32, #tpu.memory_space<vmem>>, %arg5: memref<1x128xf32, #tpu.memory_space<vmem>>, %arg6: memref<1x128xf32, #tpu.memory_space<vmem>>, %arg7: memref<1x128xf32, #tpu.memory_space<vmem>>, %arg8: memref<1x128xf32, #tpu.memory_space<vmem>>, %arg9: memref<1x128xf32, #tpu.memory_space<vmem>>) attributes {dimension_semantics = [#tpu.dimension_semantics<parallel>, #tpu.dimension_semantics<arbitrary>], iteration_bounds = array<i64: 2, 1>, scalar_prefetch = 0 : i64, scratch_operands = 5 : i64, tpu.core_type = #tpu.core_type<tc>, window_params = [{transform_indices = @transform_0, window_bounds = array<i64: 1, 8, 128>}, {transform_indices = @transform_1, window_bounds = array<i64: 1, 8, 128>}, {transform_indices = @transform_2, window_bounds = array<i64: 1, 1, 128>}]} {
    %c0_i32 = arith.constant 0 : i32
    %0 = arith.cmpi eq, %arg1, %c0_i32 : i32
    %1 = arith.extui %0 : i1 to i32
    %c0_i32_0 = arith.constant 0 : i32
    %2 = arith.cmpi ne, %1, %c0_i32_0 : i32
    scf.if %2 {
      %cst_32 = arith.constant 0.000000e+00 : f32
      %38 = vector.broadcast %cst_32 : f32 to vector<1x128xf32>
      %c0_33 = arith.constant 0 : index
      %c0_34 = arith.constant 0 : index
      %39 = vector.load %arg5[%c0_33, %c0_34] : memref<1x128xf32, #tpu.memory_space<vmem>>, vector<1x128xf32>
      tpu.vector_store %arg5[%c0_33, %c0_34], %38 {strides = array<i32>} : memref<1x128xf32, #tpu.memory_space<vmem>>, vector<1x128xf32>,
      %cst_35 = arith.constant 0.000000e+00 : f32
      %40 = vector.broadcast %cst_35 : f32 to vector<1x128xf32>
      %c0_36 = arith.constant 0 : index
      %c0_37 = arith.constant 0 : index
      %41 = vector.load %arg6[%c0_36, %c0_37] : memref<1x128xf32, #tpu.memory_space<vmem>>, vector<1x128xf32>
      tpu.vector_store %arg6[%c0_36, %c0_37], %40 {strides = array<i32>} : memref<1x128xf32, #tpu.memory_space<vmem>>, vector<1x128xf32>,
      %cst_38 = arith.constant 0.000000e+00 : f32
      %42 = vector.broadcast %cst_38 : f32 to vector<1x128xf32>
      %c0_39 = arith.constant 0 : index
      %c0_40 = arith.constant 0 : index
      %43 = vector.load %arg7[%c0_39, %c0_40] : memref<1x128xf32, #tpu.memory_space<vmem>>, vector<1x128xf32>
      tpu.vector_store %arg7[%c0_39, %c0_40], %42 {strides = array<i32>} : memref<1x128xf32, #tpu.memory_space<vmem>>, vector<1x128xf32>,
      %cst_41 = arith.constant 0.000000e+00 : f32
      %44 = vector.broadcast %cst_41 : f32 to vector<1x128xf32>
      %c0_42 = arith.constant 0 : index
      %c0_43 = arith.constant 0 : index
      %45 = vector.load %arg8[%c0_42, %c0_43] : memref<1x128xf32, #tpu.memory_space<vmem>>, vector<1x128xf32>
      tpu.vector_store %arg8[%c0_42, %c0_43], %44 {strides = array<i32>} : memref<1x128xf32, #tpu.memory_space<vmem>>, vector<1x128xf32>,
      %cst_44 = arith.constant 0.000000e+00 : f32
      %46 = vector.broadcast %cst_44 : f32 to vector<1x128xf32>
      %c0_45 = arith.constant 0 : index
      %c0_46 = arith.constant 0 : index
      %47 = vector.load %arg9[%c0_45, %c0_46] : memref<1x128xf32, #tpu.memory_space<vmem>>, vector<1x128xf32>
      tpu.vector_store %arg9[%c0_45, %c0_46], %46 {strides = array<i32>} : memref<1x128xf32, #tpu.memory_space<vmem>>, vector<1x128xf32>,
    } else {
    }
    %c0 = arith.constant 0 : index
    %c0_1 = arith.constant 0 : index
    %c0_2 = arith.constant 0 : index
    %3 = vector.load %arg2[%c0, %c0_1, %c0_2] : memref<1x8x128xf32, #tpu.memory_space<vmem>>, vector<1x8x128xf32>
    %4 = vector.shape_cast %3 : vector<1x8x128xf32> to vector<8x128xf32>
    %c0_3 = arith.constant 0 : index
    %c0_4 = arith.constant 0 : index
    %c0_5 = arith.constant 0 : index
    %5 = vector.load %arg3[%c0_3, %c0_4, %c0_5] : memref<1x8x128xf32, #tpu.memory_space<vmem>>, vector<1x8x128xf32>
    %6 = vector.shape_cast %5 : vector<1x8x128xf32> to vector<8x128xf32>
    %c0_6 = arith.constant 0 : index
    %c0_7 = arith.constant 0 : index
    %7 = vector.load %arg5[%c0_6, %c0_7] : memref<1x128xf32, #tpu.memory_space<vmem>>, vector<1x128xf32>
    %cst = arith.constant dense<0.000000e+00> : vector<128xf32>
    %8 = vector.multi_reduction <add>, %4, %cst [0] : vector<8x128xf32> to vector<128xf32>
    %9 = vector.shape_cast %8 : vector<128xf32> to vector<1x128xf32>
    %10 = arith.addf %7, %9 : vector<1x128xf32>
    %c0_8 = arith.constant 0 : index
    %c0_9 = arith.constant 0 : index
    %11 = vector.load %arg5[%c0_8, %c0_9] : memref<1x128xf32, #tpu.memory_space<vmem>>, vector<1x128xf32>
    tpu.vector_store %arg5[%c0_8, %c0_9], %10 {strides = array<i32>} : memref<1x128xf32, #tpu.memory_space<vmem>>, vector<1x128xf32>,
    %c0_10 = arith.constant 0 : index
    %c0_11 = arith.constant 0 : index
    %12 = vector.load %arg6[%c0_10, %c0_11] : memref<1x128xf32, #tpu.memory_space<vmem>>, vector<1x128xf32>
    %cst_12 = arith.constant dense<0.000000e+00> : vector<128xf32>
    %13 = vector.multi_reduction <add>, %6, %cst_12 [0] : vector<8x128xf32> to vector<128xf32>
    %14 = vector.shape_cast %13 : vector<128xf32> to vector<1x128xf32>
    %15 = arith.addf %12, %14 : vector<1x128xf32>
    %c0_13 = arith.constant 0 : index
    %c0_14 = arith.constant 0 : index
    %16 = vector.load %arg6[%c0_13, %c0_14] : memref<1x128xf32, #tpu.memory_space<vmem>>, vector<1x128xf32>
    tpu.vector_store %arg6[%c0_13, %c0_14], %15 {strides = array<i32>} : memref<1x128xf32, #tpu.memory_space<vmem>>, vector<1x128xf32>,
    %c0_15 = arith.constant 0 : index
    %c0_16 = arith.constant 0 : index
    %17 = vector.load %arg7[%c0_15, %c0_16] : memref<1x128xf32, #tpu.memory_space<vmem>>, vector<1x128xf32>
    %18 = arith.mulf %4, %4 : vector<8x128xf32>
    %cst_17 = arith.constant dense<0.000000e+00> : vector<128xf32>
    %19 = vector.multi_reduction <add>, %18, %cst_17 [0] : vector<8x128xf32> to vector<128xf32>
    %20 = vector.shape_cast %19 : vector<128xf32> to vector<1x128xf32>
    %21 = arith.addf %17, %20 : vector<1x128xf32>
    %c0_18 = arith.constant 0 : index
    %c0_19 = arith.constant 0 : index
    %22 = vector.load %arg7[%c0_18, %c0_19] : memref<1x128xf32, #tpu.memory_space<vmem>>, vector<1x128xf32>
    tpu.vector_store %arg7[%c0_18, %c0_19], %21 {strides = array<i32>} : memref<1x128xf32, #tpu.memory_space<vmem>>, vector<1x128xf32>,
    %c0_20 = arith.constant 0 : index
    %c0_21 = arith.constant 0 : index
    %23 = vector.load %arg8[%c0_20, %c0_21] : memref<1x128xf32, #tpu.memory_space<vmem>>, vector<1x128xf32>
    %24 = arith.mulf %6, %6 : vector<8x128xf32>
    %cst_22 = arith.constant dense<0.000000e+00> : vector<128xf32>
    %25 = vector.multi_reduction <add>, %24, %cst_22 [0] : vector<8x128xf32> to vector<128xf32>
    %26 = vector.shape_cast %25 : vector<128xf32> to vector<1x128xf32>
    %27 = arith.addf %23, %26 : vector<1x128xf32>
    %c0_23 = arith.constant 0 : index
    %c0_24 = arith.constant 0 : index
    %28 = vector.load %arg8[%c0_23, %c0_24] : memref<1x128xf32, #tpu.memory_space<vmem>>, vector<1x128xf32>
    tpu.vector_store %arg8[%c0_23, %c0_24], %27 {strides = array<i32>} : memref<1x128xf32, #tpu.memory_space<vmem>>, vector<1x128xf32>,
    %c0_25 = arith.constant 0 : index
    %c0_26 = arith.constant 0 : index
    %29 = vector.load %arg9[%c0_25, %c0_26] : memref<1x128xf32, #tpu.memory_space<vmem>>, vector<1x128xf32>
    %30 = arith.mulf %4, %6 : vector<8x128xf32>
    %cst_27 = arith.constant dense<0.000000e+00> : vector<128xf32>
    %31 = vector.multi_reduction <add>, %30, %cst_27 [0] : vector<8x128xf32> to vector<128xf32>
    %32 = vector.shape_cast %31 : vector<128xf32> to vector<1x128xf32>
    %33 = arith.addf %29, %32 : vector<1x128xf32>
    %c0_28 = arith.constant 0 : index
    %c0_29 = arith.constant 0 : index
    %34 = vector.load %arg9[%c0_28, %c0_29] : memref<1x128xf32, #tpu.memory_space<vmem>>, vector<1x128xf32>
    tpu.vector_store %arg9[%c0_28, %c0_29], %33 {strides = array<i32>} : memref<1x128xf32, #tpu.memory_space<vmem>>, vector<1x128xf32>,
    %c0_i32_30 = arith.constant 0 : i32
    %35 = arith.cmpi eq, %arg1, %c0_i32_30 : i32
    %36 = arith.extui %35 : i1 to i32
    %c0_i32_31 = arith.constant 0 : i32
    %37 = arith.cmpi ne, %36, %c0_i32_31 : i32
    scf.if %37 {
      %c0_32 = arith.constant 0 : index
      %c0_33 = arith.constant 0 : index
      %38 = vector.load %arg5[%c0_32, %c0_33] : memref<1x128xf32, #tpu.memory_space<vmem>>, vector<1x128xf32>
      %39 = vector.shape_cast %38 : vector<1x128xf32> to vector<1x1x128xf32>
      %cst_34 = arith.constant dense<0.000000e+00> : vector<1xf32>
      %40 = vector.multi_reduction <add>, %39, %cst_34 [1, 2] : vector<1x1x128xf32> to vector<1xf32>
      %41 = vector.shape_cast %40 : vector<1xf32> to vector<1x1x1xf32>
      %42 = vector.extract %41[0, 0, 0] : f32 from vector<1x1x1xf32>
      %c0_35 = arith.constant 0 : index
      %c0_36 = arith.constant 0 : index
      %43 = vector.load %arg6[%c0_35, %c0_36] : memref<1x128xf32, #tpu.memory_space<vmem>>, vector<1x128xf32>
      %44 = vector.shape_cast %43 : vector<1x128xf32> to vector<1x1x128xf32>
      %cst_37 = arith.constant dense<0.000000e+00> : vector<1xf32>
      %45 = vector.multi_reduction <add>, %44, %cst_37 [1, 2] : vector<1x1x128xf32> to vector<1xf32>
      %46 = vector.shape_cast %45 : vector<1xf32> to vector<1x1x1xf32>
      %47 = vector.extract %46[0, 0, 0] : f32 from vector<1x1x1xf32>
      %c0_38 = arith.constant 0 : index
      %c0_39 = arith.constant 0 : index
      %48 = vector.load %arg7[%c0_38, %c0_39] : memref<1x128xf32, #tpu.memory_space<vmem>>, vector<1x128xf32>
      %49 = vector.shape_cast %48 : vector<1x128xf32> to vector<1x1x128xf32>
      %cst_40 = arith.constant dense<0.000000e+00> : vector<1xf32>
      %50 = vector.multi_reduction <add>, %49, %cst_40 [1, 2] : vector<1x1x128xf32> to vector<1xf32>
      %51 = vector.shape_cast %50 : vector<1xf32> to vector<1x1x1xf32>
      %52 = vector.extract %51[0, 0, 0] : f32 from vector<1x1x1xf32>
      %c0_41 = arith.constant 0 : index
      %c0_42 = arith.constant 0 : index
      %53 = vector.load %arg8[%c0_41, %c0_42] : memref<1x128xf32, #tpu.memory_space<vmem>>, vector<1x128xf32>
      %54 = vector.shape_cast %53 : vector<1x128xf32> to vector<1x1x128xf32>
      %cst_43 = arith.constant dense<0.000000e+00> : vector<1xf32>
      %55 = vector.multi_reduction <add>, %54, %cst_43 [1, 2] : vector<1x1x128xf32> to vector<1xf32>
      %56 = vector.shape_cast %55 : vector<1xf32> to vector<1x1x1xf32>
      %57 = vector.extract %56[0, 0, 0] : f32 from vector<1x1x1xf32>
      %c0_44 = arith.constant 0 : index
      %c0_45 = arith.constant 0 : index
      %58 = vector.load %arg9[%c0_44, %c0_45] : memref<1x128xf32, #tpu.memory_space<vmem>>, vector<1x128xf32>
      %59 = vector.shape_cast %58 : vector<1x128xf32> to vector<1x1x128xf32>
      %cst_46 = arith.constant dense<0.000000e+00> : vector<1xf32>
      %60 = vector.multi_reduction <add>, %59, %cst_46 [1, 2] : vector<1x1x128xf32> to vector<1xf32>
      %61 = vector.shape_cast %60 : vector<1xf32> to vector<1x1x1xf32>
      %62 = vector.extract %61[0, 0, 0] : f32 from vector<1x1x1xf32>
      %63 = arith.mulf %42, %47 : f32
      %cst_47 = arith.constant 9.765625E-4 : f32
      %64 = arith.mulf %63, %cst_47 : f32
      %65 = arith.subf %62, %64 : f32
      %66 = arith.mulf %42, %42 : f32
      %cst_48 = arith.constant 9.765625E-4 : f32
      %67 = arith.mulf %66, %cst_48 : f32
      %68 = arith.subf %52, %67 : f32
      %cst_49 = arith.constant 0.000000e+00 : f32
      %69 = arith.maximumf %68, %cst_49 : f32
      %70 = arith.mulf %47, %47 : f32
      %cst_50 = arith.constant 9.765625E-4 : f32
      %71 = arith.mulf %70, %cst_50 : f32
      %72 = arith.subf %57, %71 : f32
      %cst_51 = arith.constant 0.000000e+00 : f32
      %73 = arith.maximumf %72, %cst_51 : f32
      %cst_52 = arith.constant 9.99999993E-9 : f32
      %74 = arith.addf %65, %cst_52 : f32
      %75 = arith.mulf %69, %73 : f32
      %76 = math.sqrt %75 : f32
      %cst_53 = arith.constant 9.99999993E-9 : f32
      %77 = arith.addf %76, %cst_53 : f32
      %78 = arith.divf %74, %77 : f32
      %79 = vector.broadcast %78 : f32 to vector<1x1x128xf32>
      %c0_54 = arith.constant 0 : index
      %c0_55 = arith.constant 0 : index
      %c0_56 = arith.constant 0 : index
      %80 = vector.load %arg4[%c0_54, %c0_55, %c0_56] : memref<1x1x128xf32, #tpu.memory_space<vmem>>, vector<1x1x128xf32>
      tpu.vector_store %arg4[%c0_54, %c0_55, %c0_56], %79 {strides = array<i32>} : memref<1x1x128xf32, #tpu.memory_space<vmem>>, vector<1x1x128xf32>,
    } else {
    }
    return
  }
  func.func @transform_0(%arg0: i32, %arg1: i32) -> (i32, i32, i32) {
    %c0_i32 = arith.constant 0 : i32
    %c0_i32_0 = arith.constant 0 : i32
    return %arg0, %arg1, %c0_i32 : i32, i32, i32
  }
  func.func @transform_1(%arg0: i32, %arg1: i32) -> (i32, i32, i32) {
    %c0_i32 = arith.constant 0 : i32
    %c0_i32_0 = arith.constant 0 : i32
    return %arg0, %arg1, %c0_i32 : i32, i32, i32
  }
  func.func @transform_2(%arg0: i32, %arg1: i32) -> (i32, i32, i32) {
    %c0_i32 = arith.constant 0 : i32
    %c0_i32_0 = arith.constant 0 : i32
    %c0_i32_1 = arith.constant 0 : i32
    return %arg0, %c0_i32, %c0_i32_0 : i32, i32, i32
  }
}

</mosaic_0001>

<bundles_post_ra>
// kernel: tpu_custom_call.1
= control target key start
LH: loop header
LB: loop body
LE: loop exit
PB: predicated region body
PF: predicated region fallthrough
CT: control target
= control target key end

     0   :  { %7 = vsyncpa [#allocation8], 0  ;;  %s972_s0 = inlined_call_operand.hbm [shape: f32[2,8,128], index: 0, kind: input, shape index: {}]   ;;  %s973_s1 = inlined_call_operand.hbm [shape: f32[2,8,128], index: 1, kind: input, shape index: {}]   ;;  %s974_s2 = inlined_call_operand.hbm [shape: f32[2,1,128], index: 2, kind: output, shape index: {}]  }
   0x1   :  { %9 = vsyncpa [#allocation8 + $0x1], 0 }
   0x2   :  { %10 = vsyncpa [#allocation11], 0 }
   0x3   :  { %12 = vsyncpa [#allocation11 + $0x1], 0 }
   0x4   :  { %13 = vsyncpa [#allocation9], 0 }
   0x5   :  { %15 = vsyncpa [#allocation9 + $0x1], 0  ;;  %s741_s9 = smov 0   ;;  %s743_s10 = smov 0  }
   0x6   :  { %s745_s11 = smov 0   ;;  %s747_s12 = smov 0  }
   0x7   :  { %s749_s13 = smov 0   ;;  %s751_s14 = smov 0  }
   0x8 LB: > { %s472_s15 = sadd.s32 4294967295, %s719_s14   ;;  %s473_s16 = sadd.s32 4294967294, %s719_s14   ;;  %s719_s14 = sphi %s751_s14, %s21_s14   ;;  %s715_s13 = sphi %s749_s13, %s994_s13   ;;  %s711_s12 = sphi %s747_s12, %s993_s12   ;;  %s707_s11 = sphi %s745_s11, %s992_s11   ;;  %s703_s10 = sphi %s743_s10, %s991_s10   ;;  %s699_s9 = sphi %s741_s9, %s990_s9  }
   0x9   : > { %s33_s17 = sadd.s32 1, %s715_s13  ;;  %s42_s18 = sadd.s32 1, %s707_s11 }
   0xa   : > { %p35_p0 = scmp.ge.s32.totalorder %s33_s17, 2  ;;  %p49_p1 = scmp.ne.s32.totalorder %s707_s11, %s703_s10 }
   0xb   : > { %p50_p2 = scmp.eq.s32.totalorder %s719_s14, 0  ;;  %p55_p3 = scmp.ne.s32.totalorder %s703_s10, %s699_s9 }
   0xc   : > { %s996_s17 = smov (%p35_p0, %s33_s17), 0  ;;  %p56_p5 = scmp.eq.s32.totalorder %s472_s15, 0 }
   0xd   : > { %p782_p4 = por %p50_p2, %p49_p1  ;;  %s37_s20 = ssub.s32 %s715_s13, %s996_s17 }
   0xe   : > { %p107_p6 = scmp.eq.s32.totalorder %s472_s15, 1  ;;  %p40_p7 = scmp.eq.s32.totalorder %s37_s20, 0 }
   0xf   : > { %p788_p8 = por %p56_p5, %p55_p3  ;;  %p113_p10 = scmp.eq.s32.totalorder %s473_s16, 1 }
  0x10   : > { %p792_p9 = por %p107_p6, %p49_p1  ;;  %p517_p13 = scmp.lt.s32.totalorder %s719_s14, 2 }
  0x11   : > { %s978_s21 = scalar_select %p788_p8, 1, 0 }
  0x12   : > { %s979_s22 = scalar_select %p792_p9, 1, 0 }
  0x13   : > { %s797_s23 = scalar_select %p40_p7, %s707_s11, %s42_s18  }
  0x14   : > { %p799_p11 = por %p113_p10, %p55_p3  ;;  %s806_s25 = sand.u32 1, %s707_s11  }
  0x15   : > { %s476_s26 = sshll.u32 %s806_s25, 3  ;;  %s477_s27 = sshll.u32 %s715_s13, 7 }
  0x16   : > { %s980_s24 = scalar_select %p799_p11, 1, 0 }
  0x17   : > { %s815_s30 = scalar_lea.hbm %s972_s0, %s477_s27  ;;  %s137_s3 = scalar_lea.vmem [#allocation7], %s476_s26 }
  0x18   : > { %s145_s4 = sshll.u32 %s137_s3, 4  ;;  %p823_p0 = pnand %p517_p13, %p782_p4  ;;  %s819_s4 = int_to_ptr.vmem [resolvable:$true] %s145_s4 }
  0x19   : > { %s134_s6 = scalar_lea.sflag [#allocation8], %s806_s25  ;;  %s573_s7 = scalar_lea.hbm %s815_s30, 128 }
  0x1a   : > { %p574_p3 = scmp.ne.s32.totalorder %s815_s30, %s573_s7  ;;  %p575_p5 = pneg %p823_p0 }
  0x1b   : > { %s578_s16 = scalar_lea.hbm %s972_s0, 256  ;;  %p579_p4 = scmp.lt.u32.totalorder %s815_s30, %s972_s0 }
  0x1c   : > { %p576_p6 = pnand %p575_p5, %p574_p3  ;;  %p580_p10 = scmp.lt.u32.totalorder %s578_s16, %s573_s7 }
  0x1d   : > { %p582_p12 = scmp.lt.u32.totalorder %s573_s7, %s815_s30 }
  0x1e   : > { %p577_p7 = pneg %p576_p6  ;;  %p581_p13 = por %p580_p10, %p579_p4 }
  0x20   : > { %p583_p1 = por %p582_p12, %p581_p13 }
  0x22   : > { %p584_p2 = pnand %p583_p1, %p577_p7 }
  0x24   : > { %587 = shalt.err (!%p584_p2)
}
  0x25   : > { %s588_s20 = scalar_lea.vmem %s819_s4, 128  ;;  %s721_s28 = smov [#allocation7]  }
  0x26   : > { %p589_p3 = scmp.ne.s32.totalorder %s819_s4, %s588_s20  ;;  %s593_s29 = sshll.u32 %s721_s28, 4  ;;  %s594_s29 = int_to_ptr.vmem [resolvable:$false] %s593_s29 }
  0x27   : > { %s595_s3 = scalar_lea.vmem %s594_s29, 256  ;;  %p596_p9 = scmp.lt.s32.totalorder %s819_s4, %s594_s29 }
  0x28   : > { %p591_p6 = pnand %p589_p3, %p575_p5  ;;  %p597_p4 = scmp.lt.s32.totalorder %s595_s3, %s588_s20 }
  0x2a   : > { %p592_p11 = pneg %p591_p6  ;;  %p598_p10 = por %p597_p4, %p596_p9 }
  0x2c   : > { %p599_p12 = pnand %p598_p10, %p592_p11 }
  0x2e   : > { %602 = shalt.err (!%p599_p12)
}
  0x2f   : > { %509 = dma.hbm_to_vmem [thread:$0]  (!%p823_p0), %s815_s30, 128, %s819_s4, %s134_s6  }
  0x30   : > { %p982_p1 = scmp.lt.s32.totalorder %s719_s14, 3  ;;  %p983_p2 = scmp.ge.s32.totalorder %s719_s14, 1 }
  0x31   : > { %s868_s16 = scalar_lea.hbm %s973_s1, %s477_s27  ;;  %s156_s18 = scalar_lea.vmem [#allocation10], %s476_s26 }
  0x32   : > { %p859_p7 = pnand %p983_p2, %p982_p1  ;;  %s164_s19 = sshll.u32 %s156_s18, 4  ;;  %s165_s19 = int_to_ptr.vmem [resolvable:$true] %s164_s19 }
  0x33   : > { %s153_s30 = scalar_lea.sflag [#allocation11], %s806_s25  ;;  %s603_s4 = scalar_lea.hbm %s868_s16, 128 }
  0x34   : > { %s984_s7 = scalar_select %p859_p7, 1, 0 }
  0x35   : > { %p604_p9 = scmp.ne.s32.totalorder %s868_s16, %s603_s4  ;;  %s608_s27 = scalar_lea.hbm %s973_s1, 256 }
  0x36   : > { %p609_p3 = scmp.lt.u32.totalorder %s868_s16, %s973_s1  ;;  %p610_p6 = scmp.lt.u32.totalorder %s608_s27, %s603_s4 }
  0x37   : > { %p606_p11 = pnand %p604_p9, %p575_p5  ;;  %p612_p10 = scmp.lt.u32.totalorder %s603_s4, %s868_s16 }
  0x38   : > { %p611_p4 = por %p610_p6, %p609_p3 }
  0x39   : > { %p607_p13 = pneg %p606_p11 }
  0x3a   : > { %p613_p12 = por %p612_p10, %p611_p4 }
  0x3c   : > { %p614_p1 = pnand %p613_p12, %p607_p13 }
  0x3e   : > { %617 = shalt.err (!%p614_p1)
}
  0x3f   : > { %s618_s25 = scalar_lea.vmem %s165_s19, 128  ;;  %s722_s26 = smov [#allocation10]  }
  0x40   : > { %p619_p2 = scmp.ne.s32.totalorder %s165_s19, %s618_s25  ;;  %s623_s3 = sshll.u32 %s722_s26, 4  ;;  %s624_s3 = int_to_ptr.vmem [resolvable:$false] %s623_s3 }
  0x41   : > { %s625_s8 = scalar_lea.vmem %s624_s3, 256  ;;  %p626_p8 = scmp.lt.s32.totalorder %s165_s19, %s624_s3 }
  0x42   : > { %p621_p9 = pnand %p619_p2, %p575_p5  ;;  %p627_p7 = scmp.lt.s32.totalorder %s625_s8, %s618_s25 }
  0x44   : > { %p622_p11 = pneg %p621_p9  ;;  %p628_p3 = por %p627_p7, %p626_p8 }
  0x46   : > { %p629_p6 = pnand %p628_p3, %p622_p11 }
  0x48   : > { %632 = shalt.err (!%p629_p6)
}
  0x49   : > { %512 = dma.hbm_to_vmem [thread:$0]  (!%p823_p0), %s868_s16, 128, %s165_s19, %s153_s30  }
  0x4a   : > { %p985_p13 = scmp.ne.s32.totalorder %s984_s7, 0 }
  0x4b   : > { %s895_s15 = sand.u32 (!%p985_p13), 1, %s703_s10   ;;  %p986_p5 = scmp.ne.s32.totalorder (!%p985_p13), %s978_s21, 0 }
  0x4c   : > { %173 = sbr.rel (%p985_p13) target bundleno = 475 (0x1db), region = 28  ;;  %s481_s18 = sshll.u32 (!%p985_p13), %s895_s15, 3 }
  0x4d   : > { %s176_s4 = scalar_lea.sflag (!%p985_p13), [#allocation8], %s895_s15  ;;  %s179_s6 = scalar_lea.vmem (!%p985_p13), [#allocation7], %s481_s18 }
  0x53   : > { %686 = dma.done.wait (%p986_p5), %s176_s4, 128  }
  0x54   : > { %688 = vsyncadd (%p986_p5), %s176_s4, 4294967168  ;;  %s185_s5 = scalar_lea.sflag [#allocation11], %s895_s15  ;;  %s188_s16 = scalar_lea.vmem [#allocation10], %s481_s18 }
  0x55   : > { %690 = dma.done.wait (%p986_p5), %s185_s5, 128  }
  0x56   : > { %692 = vsyncadd (%p986_p5), %s185_s5, 4294967168  ;;  %v723_v0 = vmov 0.0   ;;  %v222_v1 = vld [vmem:[%s179_s6] sm:$0xff]  ;;  %v223_v2 = vld [vmem:[%s188_s16] sm:$0xff]  ;;  %vm276_vm0 = vcmask 1040384   ;;  %s724_s8 = smov 0.0  }
  0x57   : > { %217 = vst [vmem:[#allocation2] sm:$0x1] %v723_v0  ;;  %218 = vst [vmem:[#allocation3] sm:$0x1] %v723_v0  ;;  %v225_v3 = vrot.slane %v222_v1, 4  ;;  %v243_v4 = vmul.f32 %v222_v1, %v222_v1  ;;  %v234_v5 = vrot.slane %v223_v2, 4  ;;  %v253_v6 = vmul.f32 %v223_v2, %v223_v2 }
  0x58   : > { %219 = vst [vmem:[#allocation4] sm:$0x1] %v723_v0  ;;  %220 = vst [vmem:[#allocation5] sm:$0x1] %v723_v0  ;;  %v263_v7 = vmul.f32 %v223_v2, %v222_v1  ;;  %p987_p0 = scmp.ne.s32.totalorder %s979_s22, 0 }
  0x59   : > { %221 = vst [vmem:[#allocation6] sm:$0x1] %v723_v0  ;;  %v226_v8 = vadd.f32 %v225_v3, %v222_v1  ;;  %v244_v9 = vrot.slane %v243_v4, 4  ;;  %v235_v10 = vadd.f32 %v234_v5, %v223_v2  ;;  %v254_v11 = vrot.slane %v253_v6, 4 }
  0x5a   : > { %v264_v12 = vrot.slane %v263_v7, 4 }
  0x5b   : > { %v227_v13 = vrot.slane %v226_v8, 2  ;;  %v245_v14 = vadd.f32 %v244_v9, %v243_v4  ;;  %v236_v15 = vrot.slane %v235_v10, 2  ;;  %v255_v16 = vadd.f32 %v254_v11, %v253_v6 }
  0x5c   : > { %v265_v17 = vadd.f32 %v264_v12, %v263_v7 }
  0x5d   : > { %v228_v18 = vadd.f32 %v227_v13, %v226_v8  ;;  %v246_v19 = vrot.slane %v245_v14, 2  ;;  %v237_v20 = vadd.f32 %v236_v15, %v235_v10  ;;  %v256_v21 = vrot.slane %v255_v16, 2 }
  0x5e   : > { %v266_v22 = vrot.slane %v265_v17, 2  ;;  %v224_v27 = vld [vmem:[#allocation2] sm:$0x1]  ;;  %v233_v28 = vld [vmem:[#allocation3] sm:$0x1] }
  0x5f   : > { %v229_v23 = vrot.slane %v228_v18, 1  ;;  %v247_v24 = vadd.f32 %v246_v19, %v245_v14  ;;  %v238_v25 = vrot.slane %v237_v20, 1  ;;  %v257_v26 = vadd.f32 %v256_v21, %v255_v16  ;;  %v242_v34 = vld [vmem:[#allocation4] sm:$0x1]  ;;  %v252_v35 = vld [vmem:[#allocation5] sm:$0x1] }
  0x60   : > { %v267_v29 = vadd.f32 %v266_v22, %v265_v17  ;;  %v262_v41 = vld [vmem:[#allocation6] sm:$0x1] }
  0x61   : > { %v230_v30 = vadd.f32 %v229_v23, %v228_v18  ;;  %v248_v31 = vrot.slane %v247_v24, 1  ;;  %v239_v32 = vadd.f32 %v238_v25, %v237_v20  ;;  %v258_v33 = vrot.slane %v257_v26, 1 }
  0x62   : > { %v268_v36 = vrot.slane %v267_v29, 1 }
  0x63   : > { %v231_v37 = vadd.f32 %v230_v30, %v224_v27  ;;  %v249_v38 = vadd.f32 %v248_v31, %v247_v24  ;;  %v240_v39 = vadd.f32 %v239_v32, %v233_v28  ;;  %v259_v40 = vadd.f32 %v258_v33, %v257_v26 }
  0x64   : > { %v269_v42 = vadd.f32 %v268_v36, %v267_v29 }
  0x65   : > { %232 = vst [vmem:[#allocation2] sm:$0x1] %v231_v37  ;;  %v250_v43 = vadd.f32 %v249_v38, %v242_v34  ;;  %241 = vst [vmem:[#allocation3] sm:$0x1] %v240_v39  ;;  %v260_v44 = vadd.f32 %v259_v40, %v252_v35 }
  0x66   : > { %v270_v45 = vadd.f32 %v269_v42, %v262_v41 }
  0x67   : > { %251 = vst [vmem:[#allocation4] sm:$0x1] %v250_v43  ;;  %261 = vst [vmem:[#allocation5] sm:$0x1] %v260_v44 }
  0x68   : > { %271 = vst [vmem:[#allocation6] sm:$0x1] %v270_v45 }
  0x6c   : > { %v275_v46 = vld [vmem:[#allocation2] sm:$0x1]  ;;  %v287_v47 = vld [vmem:[#allocation3] sm:$0x1] }
  0x6d   : > { %v277_v48 = vsel %vm276_vm0, %v275_v46, 0.0  ;;  %v288_v52 = vsel %vm276_vm0, %v287_v47, 0.0 }
  0x6e   : > { %278 = vadd.xlane.f32.xlu0 %v277_v48  ;;  %v298_v49 = vld [vmem:[#allocation4] sm:$0x1]  ;;  %v309_v50 = vld [vmem:[#allocation5] sm:$0x1] }
  0x6f   : > { %v299_v51 = vsel %vm276_vm0, %v298_v49, 0.0  ;;  %v320_v53 = vld [vmem:[#allocation6] sm:$0x1]  ;;  %v310_v54 = vsel %vm276_vm0, %v309_v50, 0.0 }
  0x70   : > { %300 = vadd.xlane.f32.xlu1 %v299_v51  ;;  %v321_v55 = vsel %vm276_vm0, %v320_v53, 0.0 }
  0x72   : > { %289 = vadd.xlane.f32.xlu0 %v288_v52 }
  0x74   : > { %311 = vadd.xlane.f32.xlu1 %v310_v54 }
  0x76   : > { %322 = vadd.xlane.f32.xlu0 %v321_v55 }
  0xfb   : > { %v279_v56 = vpop.xlane.xlu0 %278 }
  0xfc   : > { %v280_v57 = vrot.slane %v279_v56, 4 }
  0xfd   : > { %v301_v58 = vpop.xlane.xlu1 %300 }
  0xfe   : > { %v281_v59 = vadd.f32 %v280_v57, %v279_v56  ;;  %v302_v60 = vrot.slane %v301_v58, 4 }
  0xff   : > { %v290_v61 = vpop.xlane.xlu0 %289 }
 0x100   : > { %v282_v62 = vrot.slane %v281_v59, 2  ;;  %v303_v63 = vadd.f32 %v302_v60, %v301_v58  ;;  %v291_v0 = vrot.slane %v290_v61, 4 }
 0x101   : > { %v312_v1 = vpop.xlane.xlu1 %311 }
 0x102   : > { %v304_v2 = vrot.slane %v303_v63, 2  ;;  %v292_v3 = vadd.f32 %v291_v0, %v290_v61  ;;  %v313_v4 = vrot.slane %v312_v1, 4  ;;  %v283_v5 = vadd.f32 %v282_v62, %v281_v59 }
 0x103   : > { %v323_v6 = vpop.xlane.xlu0 %322 }
 0x104   : > { %v293_v7 = vrot.slane %v292_v3, 2  ;;  %v314_v8 = vadd.f32 %v313_v4, %v312_v1  ;;  %v324_v9 = vrot.slane %v323_v6, 4  ;;  %v284_v10 = vrot.slane %v283_v5, 1 }
 0x105   : > { %v305_v11 = vadd.f32 %v304_v2, %v303_v63 }
 0x106   : > { %v315_v12 = vrot.slane %v314_v8, 2  ;;  %v325_v13 = vadd.f32 %v324_v9, %v323_v6  ;;  %v285_v14 = vadd.f32 %v284_v10, %v283_v5  ;;  %v294_v15 = vadd.f32 %v293_v7, %v292_v3 }
 0x107   : > { %v306_v16 = vrot.slane %v305_v11, 1 }
 0x108   : > { %v316_v17 = vadd.f32 %v315_v12, %v314_v8  ;;  %v326_v18 = vrot.slane %v325_v13, 2  ;;  %486 = vpush %v285_v14  ;;  %v295_v19 = vrot.slane %v294_v15, 1 }
 0x109   : > { %v307_v23 = vadd.f32 %v306_v16, %v305_v11 }
 0x10a   : > { %v327_v20 = vadd.f32 %v326_v18, %v325_v13  ;;  %v296_v21 = vadd.f32 %v295_v19, %v294_v15  ;;  %v317_v22 = vrot.slane %v316_v17, 1 }
 0x10c   : > { %488 = vpush %v296_v21  ;;  %v318_v24 = vadd.f32 %v317_v22, %v316_v17  ;;  %v328_v25 = vrot.slane %v327_v20, 1 }
 0x10d   : > { %490 = vpush %v307_v23 }
 0x10e   : > { %492 = vpush %v318_v24  ;;  %v329_v26 = vadd.f32 %v328_v25, %v327_v20 }
 0x110   : > { %494 = vpush %v329_v26 }
 0x139   : > { %s908_s21 = spop %486 }
 0x13a   : > { %s334_s7 = smul.f32 %s908_s21, %s908_s21 }
 0x13c   : > { %s335_s19 = smul.f32 0.0009765625, %s334_s7 }
 0x13d   : > { %s912_s30 = spop %488 }
 0x13e   : > { %s331_s20 = smul.f32 %s912_s30, %s908_s21  ;;  %s491_s27 = spop %490 }
 0x13f   : > { %s338_s28 = smul.f32 %s912_s30, %s912_s30  ;;  %s336_s25 = ssub.f32 %s491_s27, %s335_s19 }
 0x140   : > { %s493_s26 = spop %492  ;;  %s332_s7 = smul.f32 0.0009765625, %s331_s20 }
 0x141   : > { %s339_s29 = smul.f32 0.0009765625, %s338_s28  ;;  %s337_s18 = smax.f32 %s724_s8, %s336_s25 }
 0x142   : > { %s495_s5 = spop %494  ;;  %s483_s27 = sshll.u32 %s711_s12, 4 }
 0x143   : > { %s340_s3 = ssub.f32 %s493_s26, %s339_s29  ;;  %s212_s28 = scalar_lea.vmem [#allocation12], %s895_s15 }
 0x144   : > { %s333_s19 = ssub.f32 %s495_s5, %s332_s7  ;;  %s373_s29 = sshll.u32 %s212_s28, 4  ;;  %s925_s29 = int_to_ptr.vmem [resolvable:$true] %s373_s29 }
 0x145   : > { %s341_s4 = smax.f32 %s724_s8, %s340_s3  ;;  %s361_s20 = scalar_lea.sflag [#allocation9], %s895_s15 }
 0x146   : > { %s343_s6 = smul.f32 %s341_s4, %s337_s18  ;;  %s342_s30 = sadd.f32 1e-08, %s333_s19 }
 0x147   : > { %s923_s18 = scalar_lea.hbm %s974_s2, %s483_s27  ;;  %s633_s4 = scalar_lea.vmem %s925_s29, 16 }
 0x148   : > { %v344_v27 = vstv %s343_s6  ;;  %p634_p8 = scmp.ne.s32.totalorder %s925_s29, %s633_s4  ;;  %s725_s12 = smov [#allocation12]  }
 0x149   : > { %569 = vrsqrt.f32 %v344_v27  ;;  %vm347_vm1 = vcmp.eq.f32.partialorder %v344_v27, inf  ;;  %v350_v30 = vand.u32 2147483648, %v344_v27  ;;  %vm349_vm2 = vcmp.eq.f32.partialorder %v344_v27, 0.0  ;;  %s637_s6 = sshll.u32 %s725_s12, 4  ;;  %s638_s6 = int_to_ptr.vmem [resolvable:$false] %s637_s6 }
 0x14a   : > { %p635_p7 = pnand %p634_p8, %p987_p0  ;;  %s639_s5 = scalar_lea.vmem %s638_s6, 32 }
 0x14b   : > { %p640_p10 = scmp.lt.s32.totalorder %s925_s29, %s638_s6  ;;  %p641_p12 = scmp.lt.s32.totalorder %s639_s5, %s633_s4 }
 0x14c   : > { %p636_p4 = pneg %p635_p7 }
 0x14d   : > { %p642_p1 = por %p641_p12, %p640_p10 }
 0x14f   : > { %p643_p2 = pnand %p642_p1, %p636_p4 }
 0x153   : > { %v570_v28 = vpop.eup %569 }
 0x154   : > { %v346_v29 = vmul.f32 %v570_v28, %v344_v27 }
 0x156   : > { %v348_v31 = vsel %vm347_vm1, %v344_v27, %v346_v29 }
 0x157   : > { %v351_v32 = vsel %vm349_vm2, %v350_v30, %v348_v31 }
 0x158   : > { %496 = vpush %v351_v32 }
 0x189   : > { %s497_s16 = spop %496 }
 0x18a   : > { %s353_s21 = sadd.f32 1e-08, %s497_s16 }
 0x18c   : > { %v354_v33 = vstv %s353_s21 }
 0x18d   : > { %571 = vrcp.f32 %v354_v33 }
 0x197   : > { %v572_v34 = vpop.eup %571 }
 0x198   : > { %498 = vpush %v572_v34 }
 0x1c9   : > { %s499_s25 = spop %498 }
 0x1ca   : > { %s357_s26 = smul.f32 %s499_s25, %s342_s30 }
 0x1cc   : > { %v358_v35 = vstv %s357_s26 }
 0x1cd   : > { %359 = vst [vmem:[%s212_s28] sm:$0x1] %v358_v35 }
 0x1ce   : > { %646 = shalt.err (!%p643_p2)
}
 0x1cf   : > { %s647_s15 = scalar_lea.hbm %s923_s18, 16  ;;  %s651_s7 = scalar_lea.hbm %s974_s2, 32 }
 0x1d0   : > { %p648_p9 = scmp.ne.s32.totalorder %s923_s18, %s647_s15  ;;  %p652_p6 = scmp.lt.u32.totalorder %s923_s18, %s974_s2 }
 0x1d1   : > { %p653_p13 = scmp.lt.u32.totalorder %s651_s7, %s647_s15  ;;  %p655_p8 = scmp.lt.u32.totalorder %s647_s15, %s923_s18 }
 0x1d2   : > { %p649_p11 = pnand %p648_p9, %p987_p0 }
 0x1d3   : > { %p654_p5 = por %p653_p13, %p652_p6 }
 0x1d4   : > { %p650_p3 = pneg %p649_p11 }
 0x1d5   : > { %p656_p7 = por %p655_p8, %p654_p5 }
 0x1d7   : > { %p657_p4 = pnand %p656_p7, %p650_p3 }
 0x1d9   : > { %660 = shalt.err (!%p657_p4)
}
 0x1da   : > { %504 = dma.vmem_to_hbm [thread:$0]  (%p987_p0), %s925_s29, 16, %s923_s18, %s361_s20  }
 0x1db PF: > { %s385_s27 = sand.u32 1, %s699_s9   ;;  %p988_p10 = scmp.ne.s32.totalorder %s980_s24, 0 }
 0x1dc   : > { %p989_p12 = scmp.ge.s32.totalorder %s719_s14, 2  ;;  %s386_s28 = scalar_lea.sflag [#allocation9], %s385_s27 }
 0x1de   : > { %p514_p1 = pnand %p989_p12, %p988_p10 }
 0x1e0   : > { %694 = dma.done.wait (!%p514_p1), %s386_s28, 16  }
 0x1e1   : > { %696 = vsyncadd (!%p514_p1), %s386_s28, 4294967280  ;;  %s21_s14 = sadd.s32 1, %s719_s14   ;;  %s990_s9 = smov %s703_s10 }
 0x1e2   : > { %p18_p2 = scmp.ge.s32.totalorder %s21_s14, 4   ;;  %s991_s10 = smov %s707_s11 }
 0x1e3   : > { %s992_s11 = smov %s797_s23  ;;  %s993_s12 = smov %s715_s13 }
 0x1e4   : > { %s994_s13 = smov %s996_s17  ;;  %20 = sbr.rel (!%p18_p2) target bundleno = 8 (0x8), region = 94 }
 0x1eb   :  { %390 = vsyncpa [#allocation8], 1 }
 0x1ec   :  { %392 = vsyncpa [#allocation8 + $0x1], 1 }
 0x1ed   :  { %393 = vsyncpa [#allocation11], 1 }
 0x1ee   :  { %395 = vsyncpa [#allocation11 + $0x1], 1 }
 0x1ef   :  { %396 = vsyncpa [#allocation9], 1 }
 0x1f0   :  { %398 = vsyncpa [#allocation9 + $0x1], 1 }

</bundles_post_ra>
